<compile_context>
chip_gen: v6e
topology: v6e:2x2x1
jax: 0.10.0
libtpu: 0.0.40
codegen_flags: <defaults>
</compile_context>

<pallas_src>
import jax
import jax.numpy as jnp
from jax.experimental import pallas as pl
from jax.experimental.pallas import tpu as pltpu

FEAT = 2048   # resnet50 fc.in_features
DIM = 128     # ImgEncoder out_dim


def _head_kernel(x_ref, scale_ref, shift_ref, w_ref, b_ref, o_ref):
    # Folded eval-mode BatchNorm1d: y = x * scale + shift   (VPU)
    h = x_ref[...] * scale_ref[...] + shift_ref[...]
    # Linear: h @ W_t + b   (MXU, f32 accumulate). DIM=128 -> lane-dense out.
    e = jnp.dot(h, w_ref[...], preferred_element_type=jnp.float32) + b_ref[...]
    # Row-wise L2 normalize (torch.nn.functional.normalize, p=2, dim=1).
    sumsq = jnp.sum(e * e, axis=-1, keepdims=True)
    inv = 1.0 / jnp.maximum(jnp.sqrt(sumsq), jnp.float32(1e-12))
    o_ref[...] = (e * inv).astype(o_ref.dtype)


def img_encoder_head(feats, bn_gamma, bn_beta, bn_mean, bn_var, w, b,
                     *, eps=1e-5, block_b=256):
    """feats: (B, 2048) f32 pooled backbone features.
       bn_*: (2048,) BatchNorm1d affine params / running stats.
       w: (128, 2048) Linear weight, b: (128,) Linear bias."""
    B = feats.shape[0]

    # Fold BatchNorm1d (inference) into a per-feature affine done in-kernel.
    scale = (bn_gamma / jnp.sqrt(bn_var + eps)).reshape(1, FEAT)
    shift = (bn_beta - bn_mean * scale[0]).reshape(1, FEAT)
    w_t = jnp.transpose(w)          # (2048, 128) so the kernel does h @ W_t
    b_row = b.reshape(1, DIM)

    # Batch tiling: TB rows per grid step (multiple of 8 sublanes), pad B up.
    tb = min(block_b, max(8, B))
    tb = (tb // 8) * 8
    bp = pl.cdiv(B, tb) * tb
    if bp != B:
        feats = jnp.pad(feats, ((0, bp - B), (0, 0)))

    out = pl.pallas_call(
        _head_kernel,
        out_shape=jax.ShapeDtypeStruct((bp, DIM), jnp.float32),
        grid_spec=pltpu.PrefetchScalarGridSpec(
            num_scalar_prefetch=0,
            grid=(bp // tb,),
            in_specs=[
                pl.BlockSpec((tb, FEAT), lambda i: (i, 0)),     # x tile (pipelined)
                pl.BlockSpec((1, FEAT), lambda i: (0, 0)),      # BN scale (resident)
                pl.BlockSpec((1, FEAT), lambda i: (0, 0)),      # BN shift (resident)
                pl.BlockSpec((FEAT, DIM), lambda i: (0, 0)),    # W_t (resident)
                pl.BlockSpec((1, DIM), lambda i: (0, 0)),       # bias (resident)
            ],
            out_specs=pl.BlockSpec((tb, DIM), lambda i: (i, 0)),
        ),
        compiler_params=pltpu.CompilerParams(
            dimension_semantics=("parallel",),   # megacore sharding on v7x
        ),
    )(feats, scale, shift, w_t, b_row)
    return out[:B]


def _reference(feats, bn_gamma, bn_beta, bn_mean, bn_var, w, b, eps=1e-5):
    h = (feats - bn_mean) / jnp.sqrt(bn_var + eps) * bn_gamma + bn_beta
    e = h @ w.T + b
    n = jnp.sqrt(jnp.sum(e * e, axis=1, keepdims=True))
    return e / jnp.maximum(n, 1e-12)


if __name__ == "__main__":
    key = jax.random.PRNGKey(0)
    kf, kg, kb, km, kv, kw, kbias = jax.random.split(key, 7)

    B = 4  # small demo batch; kernel tiles/pads internally
    feats = jax.random.normal(kf, (B, FEAT), dtype=jnp.float32)

    # BatchNorm1d(2048) parameters / running stats.
    bn_gamma = 1.0 + 0.1 * jax.random.normal(kg, (FEAT,), dtype=jnp.float32)
    bn_beta = 0.1 * jax.random.normal(kb, (FEAT,), dtype=jnp.float32)
    bn_mean = 0.1 * jax.random.normal(km, (FEAT,), dtype=jnp.float32)
    bn_var = jax.random.uniform(kv, (FEAT,), dtype=jnp.float32,
                                minval=0.5, maxval=1.5)

    # Linear(2048, 128) parameters (nn.Linear shapes: W (128, 2048), b (128,)).
    bound = 1.0 / (FEAT ** 0.5)
    w = jax.random.uniform(kw, (DIM, FEAT), dtype=jnp.float32,
                           minval=-bound, maxval=bound)
    b = jax.random.uniform(kbias, (DIM,), dtype=jnp.float32,
                           minval=-bound, maxval=bound)

    out = img_encoder_head(feats, bn_gamma, bn_beta, bn_mean, bn_var, w, b)
    out = jax.block_until_ready(out)

    ref = _reference(feats, bn_gamma, bn_beta, bn_mean, bn_var, w, b)
    assert out.shape == (B, DIM)
    assert out.dtype == jnp.float32
    assert jnp.allclose(out, ref, atol=1e-4, rtol=1e-4), (
        float(jnp.max(jnp.abs(out - ref))))
    # Rows are unit-norm (L2 normalize semantics).
    assert jnp.allclose(jnp.linalg.norm(out, axis=1), 1.0, atol=1e-4)

    print("KERNEL_OK")
</pallas_src>

<mosaic_0001>
module attributes {stable_mosaic.version = 11 : i64} {
  func.func @_head_kernel(%arg0: i32, %arg1: memref<8x2048xf32, #tpu.memory_space<vmem>>, %arg2: memref<1x2048xf32, #tpu.memory_space<vmem>>, %arg3: memref<1x2048xf32, #tpu.memory_space<vmem>>, %arg4: memref<2048x128xf32, #tpu.memory_space<vmem>>, %arg5: memref<1x128xf32, #tpu.memory_space<vmem>>, %arg6: memref<8x128xf32, #tpu.memory_space<vmem>>) attributes {dimension_semantics = [#tpu.dimension_semantics<parallel>], iteration_bounds = array<i64: 1>, scalar_prefetch = 0 : i64, scratch_operands = 0 : i64, tpu.core_type = #tpu.core_type<tc>, window_params = [{transform_indices = @transform_0, window_bounds = array<i64: 8, 2048>}, {pipeline_mode = #tpu.pipeline_mode<synchronous>, transform_indices = @transform_1, window_bounds = array<i64: 1, 2048>}, {pipeline_mode = #tpu.pipeline_mode<synchronous>, transform_indices = @transform_2, window_bounds = array<i64: 1, 2048>}, {pipeline_mode = #tpu.pipeline_mode<synchronous>, transform_indices = @transform_3, window_bounds = array<i64: 2048, 128>}, {pipeline_mode = #tpu.pipeline_mode<synchronous>, transform_indices = @transform_4, window_bounds = array<i64: 1, 128>}, {transform_indices = @transform_5, window_bounds = array<i64: 8, 128>}]} {
    %c0 = arith.constant 0 : index
    %c0_0 = arith.constant 0 : index
    %0 = vector.load %arg1[%c0, %c0_0] : memref<8x2048xf32, #tpu.memory_space<vmem>>, vector<8x2048xf32>
    %c0_1 = arith.constant 0 : index
    %c0_2 = arith.constant 0 : index
    %1 = vector.load %arg2[%c0_1, %c0_2] : memref<1x2048xf32, #tpu.memory_space<vmem>>, vector<1x2048xf32>
    %2 = vector.broadcast %1 : vector<1x2048xf32> to vector<8x2048xf32>
    %3 = arith.mulf %0, %2 : vector<8x2048xf32>
    %c0_3 = arith.constant 0 : index
    %c0_4 = arith.constant 0 : index
    %4 = vector.load %arg3[%c0_3, %c0_4] : memref<1x2048xf32, #tpu.memory_space<vmem>>, vector<1x2048xf32>
    %5 = vector.broadcast %4 : vector<1x2048xf32> to vector<8x2048xf32>
    %6 = arith.addf %3, %5 : vector<8x2048xf32>
    %c0_5 = arith.constant 0 : index
    %c0_6 = arith.constant 0 : index
    %7 = vector.load %arg4[%c0_5, %c0_6] : memref<2048x128xf32, #tpu.memory_space<vmem>>, vector<2048x128xf32>
    %cst = arith.constant dense<0.000000e+00> : vector<8x128xf32>
    %8 = tpu.matmul %6, %7, %cst {dimension_numbers = #tpu.dot_dimension_numbers<[1], [0], [0], [1], [0, 0, 1, 1], [], []>} : vector<8x2048xf32>, vector<2048x128xf32>, vector<8x128xf32> -> vector<8x128xf32>
    %c0_7 = arith.constant 0 : index
    %c0_8 = arith.constant 0 : index
    %9 = vector.load %arg5[%c0_7, %c0_8] : memref<1x128xf32, #tpu.memory_space<vmem>>, vector<1x128xf32>
    %10 = vector.broadcast %9 : vector<1x128xf32> to vector<8x128xf32>
    %11 = arith.addf %8, %10 : vector<8x128xf32>
    %12 = arith.mulf %11, %11 : vector<8x128xf32>
    %cst_9 = arith.constant dense<0.000000e+00> : vector<8xf32>
    %13 = vector.multi_reduction <add>, %12, %cst_9 [1] : vector<8x128xf32> to vector<8xf32>
    %14 = vector.shape_cast %13 : vector<8xf32> to vector<8x1xf32>
    %15 = math.sqrt %14 : vector<8x1xf32>
    %cst_10 = arith.constant 9.99999996E-13 : f32
    %16 = vector.broadcast %cst_10 : f32 to vector<8x1xf32>
    %17 = arith.maximumf %15, %16 : vector<8x1xf32>
    %cst_11 = arith.constant 1.000000e+00 : f32
    %18 = vector.broadcast %cst_11 : f32 to vector<8x1xf32>
    %19 = arith.divf %18, %17 : vector<8x1xf32>
    %20 = vector.broadcast %19 : vector<8x1xf32> to vector<8x128xf32>
    %21 = arith.mulf %11, %20 : vector<8x128xf32>
    %c0_12 = arith.constant 0 : index
    %c0_13 = arith.constant 0 : index
    %22 = vector.load %arg6[%c0_12, %c0_13] : memref<8x128xf32, #tpu.memory_space<vmem>>, vector<8x128xf32>
    tpu.vector_store %arg6[%c0_12, %c0_13], %21 {strides = array<i32>} : memref<8x128xf32, #tpu.memory_space<vmem>>, vector<8x128xf32>,
    return
  }
  func.func @transform_0(%arg0: i32) -> (i32, i32) {
    %c0_i32 = arith.constant 0 : i32
    %c0_i32_0 = arith.constant 0 : i32
    return %arg0, %c0_i32 : i32, i32
  }
  func.func @transform_1(%arg0: i32) -> (i32, i32) {
    %c0_i32 = arith.constant 0 : i32
    %c0_i32_0 = arith.constant 0 : i32
    %c0_i32_1 = arith.constant 0 : i32
    return %c0_i32, %c0_i32_0 : i32, i32
  }
  func.func @transform_2(%arg0: i32) -> (i32, i32) {
    %c0_i32 = arith.constant 0 : i32
    %c0_i32_0 = arith.constant 0 : i32
    %c0_i32_1 = arith.constant 0 : i32
    return %c0_i32, %c0_i32_0 : i32, i32
  }
  func.func @transform_3(%arg0: i32) -> (i32, i32) {
    %c0_i32 = arith.constant 0 : i32
    %c0_i32_0 = arith.constant 0 : i32
    %c0_i32_1 = arith.constant 0 : i32
    return %c0_i32, %c0_i32_0 : i32, i32
  }
  func.func @transform_4(%arg0: i32) -> (i32, i32) {
    %c0_i32 = arith.constant 0 : i32
    %c0_i32_0 = arith.constant 0 : i32
    %c0_i32_1 = arith.constant 0 : i32
    return %c0_i32, %c0_i32_0 : i32, i32
  }
  func.func @transform_5(%arg0: i32) -> (i32, i32) {
    %c0_i32 = arith.constant 0 : i32
    %c0_i32_0 = arith.constant 0 : i32
    return %arg0, %c0_i32 : i32, i32
  }
}

</mosaic_0001>

<bundles_post_ra>
// kernel: tpu_custom_call.1
= control target key start
LH: loop header
LB: loop body
LE: loop exit
PB: predicated region body
PF: predicated region fallthrough
CT: control target
= control target key end

     0   :  { %10 = vsyncpa [#allocation3], 0  ;;  %s1694_s0 = inlined_call_operand.hbm [shape: f32[8,2048], index: 0, kind: input, shape index: {}]   ;;  %s1695_s1 = inlined_call_operand.hbm [shape: f32[1,2048], index: 1, kind: input, shape index: {}]   ;;  %s1696_s2 = inlined_call_operand.hbm [shape: f32[1,2048], index: 2, kind: input, shape index: {}]   ;;  %s1697_s3 = inlined_call_operand.hbm [shape: f32[2048,128], index: 3, kind: input, shape index: {}]   ;;  %s1698_s4 = inlined_call_operand.vmem [shape: f32[1,128], index: 4, kind: input, shape index: {}]   ;;  %s1699_s5 = inlined_call_operand.hbm [shape: f32[8,128], index: 5, kind: output, shape index: {}]  }
   0x1   :  { %11 = vsyncpa [#allocation6], 0 }
   0x2   :  { %12 = vsyncpa [#allocation9], 0 }
   0x3   :  { %13 = vsyncpa [#allocation4], 0  ;;  %s1541_s18 = smov [#allocation5]   ;;  %s1542_s20 = smov [#allocation2]  }
   0x4   :  { %s30_s19 = sshll.u32 %s1541_s18, 4  ;;  %s20_s21 = sshll.u32 %s1542_s20, 4  ;;  %s31_s19 = int_to_ptr.vmem [resolvable:$true] %s30_s19  ;;  %s21_s21 = int_to_ptr.vmem [resolvable:$true] %s20_s21 }
   0x5   :  { %s1441_s22 = scalar_lea.vmem %s31_s19, 256  ;;  %p1446_p1 = scmp.lt.s32.totalorder %s31_s19, %s31_s19 }
   0x6   :  { %p1442_p0 = scmp.ne.s32.totalorder %s31_s19, %s1441_s22  ;;  %p1447_p2 = scmp.lt.s32.totalorder %s1441_s22, %s1441_s22 }
   0x8   :  { %p1448_p3 = por %p1447_p2, %p1446_p1 }
   0xa   :  { %p1449_p4 = pnand %p1448_p3, %p1442_p0 }
   0xc   :  { %1452 = shalt.err (!%p1449_p4)
}
   0xd   :  { %33 = dma.hbm_to_vmem [thread:$0]  %s1695_s1, 256, %s31_s19, [#allocation6]  }
   0xe   :  { %s1461_s25 = scalar_lea.vmem %s21_s21, 2048  ;;  %p1466_p6 = scmp.lt.s32.totalorder %s21_s21, %s21_s21 }
   0xf   :  { %p1462_p5 = scmp.ne.s32.totalorder %s21_s21, %s1461_s25  ;;  %p1467_p7 = scmp.lt.s32.totalorder %s1461_s25, %s1461_s25 }
  0x11   :  { %p1468_p8 = por %p1467_p7, %p1466_p6 }
  0x13   :  { %p1469_p9 = pnand %p1468_p8, %p1462_p5 }
  0x15   :  { %1472 = shalt.err (!%p1469_p9)
}
  0x16   :  { %23 = dma.hbm_to_vmem [thread:$0]  %s1694_s0, 2048, %s21_s21, [#allocation3]  }
  0x17   :  { %s1543_s28 = smov [#allocation7]   ;;  %s1544_s30 = smov [#allocation8]  }
  0x18   :  { %s40_s29 = sshll.u32 %s1543_s28, 4  ;;  %s49_s6 = sshll.u32 %s1544_s30, 4  ;;  %s41_s29 = int_to_ptr.vmem [resolvable:$true] %s40_s29  ;;  %s50_s6 = int_to_ptr.vmem [resolvable:$true] %s49_s6 }
  0x19   :  { %s1481_s7 = scalar_lea.vmem %s41_s29, 256  ;;  %p1486_p11 = scmp.lt.s32.totalorder %s41_s29, %s41_s29 }
  0x1a   :  { %p1482_p10 = scmp.ne.s32.totalorder %s41_s29, %s1481_s7  ;;  %p1487_p12 = scmp.lt.s32.totalorder %s1481_s7, %s1481_s7 }
  0x1c   :  { %p1488_p13 = por %p1487_p12, %p1486_p11 }
  0x1e   :  { %p1489_p0 = pnand %p1488_p13, %p1482_p10 }
  0x20   :  { %1492 = shalt.err (!%p1489_p0)
}
  0x21   :  { %43 = dma.hbm_to_vmem [thread:$0]  %s1696_s2, 256, %s41_s29, [#allocation6]  }
  0x22   :  { %s1501_s9 = scalar_lea.vmem %s50_s6, 32768  ;;  %p1506_p2 = scmp.lt.s32.totalorder %s50_s6, %s50_s6 }
  0x23   :  { %p1502_p1 = scmp.ne.s32.totalorder %s50_s6, %s1501_s9  ;;  %p1507_p3 = scmp.lt.s32.totalorder %s1501_s9, %s1501_s9 }
  0x25   :  { %p1508_p4 = por %p1507_p3, %p1506_p2 }
  0x27   :  { %p1509_p5 = pnand %p1508_p4, %p1502_p1 }
  0x29   :  { %1512 = shalt.err (!%p1509_p5)
}
  0x2a   :  { %s1545_s0 = smov 128   ;;  %s1546_s10 = smov 8  }
  0x2b   :  { %55 = dma.hbm_to_vmem [thread:$0]  %s1697_s3, 32768, %s50_s6, [#allocation9], %s1545_s0, %s1545_s0, %s1546_s10  }
  0x2c   :  { %1533 = dma.done.wait [#allocation3], 2048  }
  0x2d   :  { %1534 = vsyncadd [#allocation3], 4294965248 }
  0x2e   :  { %1535 = dma.done.wait [#allocation6], 512  }
  0x2f   :  { %1536 = vsyncadd [#allocation6], 4294966784 }
  0x30   :  { %1537 = dma.done.wait [#allocation9], 32768  }
  0x31   :  { %1538 = vsyncadd [#allocation9], 4294934528  ;;  %v317_v0 = vld [vmem:[#allocation8 + $0xf8] sm:$0xff]  ;;  %v316_v4 = vld [vmem:[#allocation8 + $0xf0] sm:$0xff]  ;;  %v90_v26 = vlaneseq }
  0x32   :  { %v349_v1 = vld [vmem:[#allocation8 + $0x1f8] sm:$0xff]  ;;  %1142 = vmatprep.subr.mxu0 %v317_v0  ;;  %v348_v5 = vld [vmem:[#allocation8 + $0x1f0] sm:$0xff]  ;;  %v315_v8 = vld [vmem:[#allocation8 + $0xe8] sm:$0xff] }
  0x33   :  { %v301_v2 = vld [vmem:[#allocation8 + $0x78] sm:$0xff]  ;;  %1177 = vmatprep.subr.mxu1 %v349_v1  ;;  %v300_v6 = vld [vmem:[#allocation8 + $0x70] sm:$0xff]  ;;  %v347_v9 = vld [vmem:[#allocation8 + $0x1e8] sm:$0xff]  ;;  %v1590_v35 = vshrl.u32 %v90_v26, 7 }
  0x34   :  { %v333_v3 = vld [vmem:[#allocation8 + $0x178] sm:$0xff]  ;;  %1143 = vmatpush3.msra.mxu0 %v301_v2  ;;  %v332_v7 = vld [vmem:[#allocation8 + $0x170] sm:$0xff]  ;;  %v299_v10 = vld [vmem:[#allocation8 + $0x68] sm:$0xff] }
  0x35   :  { %1178 = vmatpush3.msra.mxu1 %v333_v3  ;;  %1144 = vmatprep.subr.mxu0 %v316_v4  ;;  %v331_v11 = vld [vmem:[#allocation8 + $0x168] sm:$0xff]  ;;  %v314_v12 = vld [vmem:[#allocation8 + $0xe0] sm:$0xff]  ;;  %v313_v16 = vld [vmem:[#allocation8 + $0xd8] sm:$0xff]  ;;  %v1593_v44 = vsub.s32 1, %v1590_v35  ;;  %v1596_v45 = vsub.s32 0, %v1590_v35  ;;  %v1599_v49 = vsub.s32 3, %v1590_v35 }
  0x36   :  { %1179 = vmatprep.subr.mxu1 %v348_v5  ;;  %1145 = vmatpush3.msra.mxu0 %v300_v6  ;;  %v346_v13 = vld [vmem:[#allocation8 + $0x1e0] sm:$0xff]  ;;  %v345_v17 = vld [vmem:[#allocation8 + $0x1d8] sm:$0xff]  ;;  %v312_v20 = vld [vmem:[#allocation8 + $0xd0] sm:$0xff]  ;;  %v1602_v53 = vsub.s32 2, %v1590_v35 }
  0x37   :  { %1180 = vmatpush3.msra.mxu1 %v332_v7  ;;  %1146 = vmatprep.subr.mxu0 %v315_v8  ;;  %v298_v14 = vld [vmem:[#allocation8 + $0x60] sm:$0xff]  ;;  %v297_v18 = vld [vmem:[#allocation8 + $0x58] sm:$0xff]  ;;  %v344_v21 = vld [vmem:[#allocation8 + $0x1d0] sm:$0xff] }
  0x38   :  { %1181 = vmatprep.subr.mxu1 %v347_v9  ;;  %v330_v15 = vld [vmem:[#allocation8 + $0x160] sm:$0xff]  ;;  %1147 = vmatpush3.msra.mxu0 %v299_v10  ;;  %v329_v19 = vld [vmem:[#allocation8 + $0x158] sm:$0xff]  ;;  %v296_v22 = vld [vmem:[#allocation8 + $0x50] sm:$0xff] }
  0x39   :  { %1182 = vmatpush3.msra.mxu1 %v331_v11  ;;  %1148 = vmatprep.subr.mxu0 %v314_v12  ;;  %v328_v23 = vld [vmem:[#allocation8 + $0x150] sm:$0xff]  ;;  %v311_v24 = vld [vmem:[#allocation8 + $0xc8] sm:$0xff]  ;;  %v310_v29 = vld [vmem:[#allocation8 + $0xc0] sm:$0xff] }
  0x3a   :  { %1183 = vmatprep.subr.mxu1 %v346_v13  ;;  %1149 = vmatpush3.msra.mxu0 %v298_v14  ;;  %v343_v25 = vld [vmem:[#allocation8 + $0x1c8] sm:$0xff]  ;;  %v342_v30 = vld [vmem:[#allocation8 + $0x1c0] sm:$0xff]  ;;  %v309_v33 = vld [vmem:[#allocation8 + $0xb8] sm:$0xff] }
  0x3b   :  { %1184 = vmatpush3.msra.mxu1 %v330_v15  ;;  %1150 = vmatprep.subr.mxu0 %v313_v16  ;;  %v295_v27 = vld [vmem:[#allocation8 + $0x48] sm:$0xff]  ;;  %v294_v31 = vld [vmem:[#allocation8 + $0x40] sm:$0xff]  ;;  %v341_v34 = vld [vmem:[#allocation8 + $0x1b8] sm:$0xff] }
  0x3c   :  { %1185 = vmatprep.subr.mxu1 %v345_v17  ;;  %1151 = vmatpush3.msra.mxu0 %v297_v18  ;;  %v327_v28 = vld [vmem:[#allocation8 + $0x148] sm:$0xff]  ;;  %v326_v32 = vld [vmem:[#allocation8 + $0x140] sm:$0xff]  ;;  %v293_v36 = vld [vmem:[#allocation8 + $0x38] sm:$0xff] }
  0x3d   :  { %1186 = vmatpush3.msra.mxu1 %v329_v19  ;;  %1152 = vmatprep.subr.mxu0 %v312_v20  ;;  %v325_v37 = vld [vmem:[#allocation8 + $0x138] sm:$0xff]  ;;  %v308_v38 = vld [vmem:[#allocation8 + $0xb0] sm:$0xff]  ;;  %v307_v42 = vld [vmem:[#allocation8 + $0xa8] sm:$0xff] }
  0x3e   :  { %1187 = vmatprep.subr.mxu1 %v344_v21  ;;  %1153 = vmatpush3.msra.mxu0 %v296_v22  ;;  %v340_v39 = vld [vmem:[#allocation8 + $0x1b0] sm:$0xff]  ;;  %v339_v43 = vld [vmem:[#allocation8 + $0x1a8] sm:$0xff]  ;;  %v306_v48 = vld [vmem:[#allocation8 + $0xa0] sm:$0xff] }
  0x3f   :  { %1188 = vmatpush3.msra.mxu1 %v328_v23  ;;  %1154 = vmatprep.subr.mxu0 %v311_v24  ;;  %v292_v40 = vld [vmem:[#allocation8 + $0x30] sm:$0xff]  ;;  %v291_v46 = vld [vmem:[#allocation8 + $0x28] sm:$0xff]  ;;  %v338_v50 = vld [vmem:[#allocation8 + $0x1a0] sm:$0xff] }
  0x40   :  { %1189 = vmatprep.subr.mxu1 %v343_v25  ;;  %1155 = vmatpush3.msra.mxu0 %v295_v27  ;;  %v324_v41 = vld [vmem:[#allocation8 + $0x130] sm:$0xff]  ;;  %v323_v47 = vld [vmem:[#allocation8 + $0x128] sm:$0xff]  ;;  %v290_v51 = vld [vmem:[#allocation8 + $0x20] sm:$0xff] }
  0x41   :  { %1190 = vmatpush3.msra.mxu1 %v327_v28  ;;  %1156 = vmatprep.subr.mxu0 %v310_v29  ;;  %v322_v52 = vld [vmem:[#allocation8 + $0x120] sm:$0xff]  ;;  %v71_v54 = vld [vmem:[#allocation2 + $0x8] sm:$0xff]  ;;  %v1606_v56 = vld [vmem:[#allocation7] sm:$0xff] }
  0x42   :  { %1191 = vmatprep.subr.mxu1 %v342_v30  ;;  %1157 = vmatpush3.msra.mxu0 %v294_v31  ;;  %v1604_v55 = vld [vmem:[#allocation5] sm:$0xff]  ;;  %v305_v57 = vld [vmem:[#allocation8 + $0x98] sm:$0xff]  ;;  %v304_v2 = vld [vmem:[#allocation8 + $0x90] sm:$0xff]  ;;  %v197_v5 = vrot.slane %v1606_v56, %v1593_v44  ;;  %v193_v11 = vrot.slane %v1606_v56, %v1596_v45  ;;  %v205_v15 = vrot.slane %v1606_v56, %v1599_v49 }
  0x43   :  { %1192 = vmatpush3.msra.mxu1 %v326_v32  ;;  %1158 = vmatprep.subr.mxu0 %v309_v33  ;;  %v337_v58 = vld [vmem:[#allocation8 + $0x198] sm:$0xff]  ;;  %v97_v59 = vrot.slane %v1604_v55, %v1593_v44  ;;  %v70_v60 = vld [vmem:[#allocation2] sm:$0xff]  ;;  %v93_v61 = vrot.slane %v1604_v55, %v1596_v45  ;;  %v105_v1 = vrot.slane %v1604_v55, %v1599_v49  ;;  %v336_v3 = vld [vmem:[#allocation8 + $0x190] sm:$0xff] }
  0x44   :  { %1193 = vmatprep.subr.mxu1 %v341_v34  ;;  %1159 = vmatpush3.msra.mxu0 %v293_v36  ;;  %v289_v62 = vld [vmem:[#allocation8 + $0x18] sm:$0xff]  ;;  %v72_v6 = vld [vmem:[#allocation2 + $0x10] sm:$0xff]  ;;  %v101_v7 = vrot.slane %v1604_v55, %v1602_v53  ;;  %v303_v12 = vld [vmem:[#allocation8 + $0x88] sm:$0xff]  ;;  %v201_v19 = vrot.slane %v1606_v56, %v1602_v53 }
  0x45   :  { %1194 = vmatpush3.msra.mxu1 %v325_v37  ;;  %1160 = vmatprep.subr.mxu0 %v308_v38  ;;  %v321_v63 = vld [vmem:[#allocation8 + $0x118] sm:$0xff]  ;;  %v171_v4 = vmul.f32 %v97_v59, %v71_v54  ;;  %v288_v8 = vld [vmem:[#allocation8 + $0x10] sm:$0xff]  ;;  %v170_v10 = vmul.f32 %v93_v61, %v70_v60  ;;  %v335_v13 = vld [vmem:[#allocation8 + $0x188] sm:$0xff] }
  0x46   :  { %1195 = vmatprep.subr.mxu1 %v340_v39  ;;  %1161 = vmatpush3.msra.mxu0 %v292_v40  ;;  %v73_v0 = vld [vmem:[#allocation2 + $0x18] sm:$0xff]  ;;  %v320_v9 = vld [vmem:[#allocation8 + $0x110] sm:$0xff]  ;;  %v287_v16 = vld [vmem:[#allocation8 + $0x8] sm:$0xff]  ;;  %v172_v18 = vmul.f32 %v101_v7, %v72_v6 }
  0x47   :  { %1196 = vmatpush3.msra.mxu1 %v324_v41  ;;  %1162 = vmatprep.subr.mxu0 %v307_v42  ;;  %v173_v14 = vmul.f32 %v105_v1, %v73_v0  ;;  %v319_v17 = vld [vmem:[#allocation8 + $0x108] sm:$0xff]  ;;  %v302_v20 = vld [vmem:[#allocation8 + $0x80] sm:$0xff]  ;;  %v271_v22 = vadd.f32 %v197_v5, %v171_v4  ;;  %v270_v24 = vadd.f32 %v193_v11, %v170_v10  ;;  %v381_v27 = vld [vmem:[#allocation8 + $0x2f8] sm:$0xff] }
  0x48   :  { %1197 = vmatprep.subr.mxu1 %v339_v43  ;;  %1163 = vmatpush3.msra.mxu0 %v291_v46  ;;  %v334_v21 = vld [vmem:[#allocation8 + $0x180] sm:$0xff]  ;;  %v272_v28 = vadd.f32 %v201_v19, %v172_v18  ;;  %v413_v29 = vld [vmem:[#allocation8 + $0x3f8] sm:$0xff]  ;;  %v380_v32 = vld [vmem:[#allocation8 + $0x2f0] sm:$0xff]  ;;  %v1634_v18 = vsub.s32 6, %v1590_v35 }
  0x49   :  { %1198 = vmatpush3.msra.mxu1 %v323_v47  ;;  %1164 = vmatprep.subr.mxu0 %v306_v48  ;;  %v286_v23 = vld [vmem:[#allocation8] sm:$0xff]  ;;  %v273_v26 = vadd.f32 %v205_v15, %v173_v14  ;;  %v365_v30 = vld [vmem:[#allocation8 + $0x278] sm:$0xff]  ;;  %v412_v33 = vld [vmem:[#allocation8 + $0x3f0] sm:$0xff]  ;;  %v1631_v15 = vsub.s32 7, %v1590_v35 }
  0x4a   :  { %1199 = vmatprep.subr.mxu1 %v338_v50  ;;  %1165 = vmatpush3.msra.mxu0 %v290_v51  ;;  %v318_v25 = vld [vmem:[#allocation8 + $0x100] sm:$0xff]  ;;  %v397_v31 = vld [vmem:[#allocation8 + $0x378] sm:$0xff]  ;;  %v364_v34 = vld [vmem:[#allocation8 + $0x270] sm:$0xff] }
  0x4b   :  { %1200 = vmatpush3.msra.mxu1 %v322_v52  ;;  %1166 = vmatprep.subr.mxu0 %v305_v57  ;;  %v396_v36 = vld [vmem:[#allocation8 + $0x370] sm:$0xff]  ;;  %v379_v37 = vld [vmem:[#allocation8 + $0x2e8] sm:$0xff]  ;;  %v378_v41 = vld [vmem:[#allocation8 + $0x2e0] sm:$0xff] }
  0x4c   :  { %1201 = vmatprep.subr.mxu1 %v337_v58  ;;  %1167 = vmatpush3.msra.mxu0 %v289_v62  ;;  %v411_v38 = vld [vmem:[#allocation8 + $0x3e8] sm:$0xff]  ;;  %v410_v42 = vld [vmem:[#allocation8 + $0x3e0] sm:$0xff]  ;;  %v377_v47 = vld [vmem:[#allocation8 + $0x2d8] sm:$0xff] }
  0x4d   :  { %1202 = vmatpush3.msra.mxu1 %v321_v63  ;;  %1168 = vmatprep.subr.mxu0 %v304_v2  ;;  %v363_v39 = vld [vmem:[#allocation8 + $0x268] sm:$0xff]  ;;  %v362_v43 = vld [vmem:[#allocation8 + $0x260] sm:$0xff]  ;;  %v409_v48 = vld [vmem:[#allocation8 + $0x3d8] sm:$0xff] }
  0x4e   :  { %1203 = vmatprep.subr.mxu1 %v336_v3  ;;  %1169 = vmatpush3.msra.mxu0 %v288_v8  ;;  %v395_v40 = vld [vmem:[#allocation8 + $0x368] sm:$0xff]  ;;  %v394_v46 = vld [vmem:[#allocation8 + $0x360] sm:$0xff]  ;;  %v361_v50 = vld [vmem:[#allocation8 + $0x258] sm:$0xff] }
  0x4f   :  { %1204 = vmatpush3.msra.mxu1 %v320_v9  ;;  %1170 = vmatprep.subr.mxu0 %v303_v12  ;;  %v393_v51 = vld [vmem:[#allocation8 + $0x358] sm:$0xff]  ;;  %v376_v52 = vld [vmem:[#allocation8 + $0x2d0] sm:$0xff]  ;;  %v375_v59 = vld [vmem:[#allocation8 + $0x2c8] sm:$0xff]  ;;  %v1625_v9 = vsub.s32 5, %v1590_v35  ;;  %v1628_v12 = vsub.s32 4, %v1590_v35 }
  0x50   :  { %1205 = vmatprep.subr.mxu1 %v335_v13  ;;  %1171 = vmatpush3.msra.mxu0 %v287_v16  ;;  %v408_v54 = vld [vmem:[#allocation8 + $0x3d0] sm:$0xff]  ;;  %v407_v60 = vld [vmem:[#allocation8 + $0x3c8] sm:$0xff]  ;;  %v374_v63 = vld [vmem:[#allocation8 + $0x2c0] sm:$0xff] }
  0x51   :  { %1206 = vmatpush3.msra.mxu1 %v319_v17  ;;  %1172 = vmatprep.subr.mxu0 %v302_v20  ;;  %v360_v57 = vld [vmem:[#allocation8 + $0x250] sm:$0xff]  ;;  %v359_v61 = vld [vmem:[#allocation8 + $0x248] sm:$0xff]  ;;  %v406_v0 = vld [vmem:[#allocation8 + $0x3c0] sm:$0xff] }
  0x52   :  { %1207 = vmatprep.subr.mxu1 %v334_v21  ;;  %1173 = vmatpush3.msra.mxu0 %v286_v23  ;;  %v392_v58 = vld [vmem:[#allocation8 + $0x350] sm:$0xff]  ;;  %v391_v62 = vld [vmem:[#allocation8 + $0x348] sm:$0xff]  ;;  %v358_v1 = vld [vmem:[#allocation8 + $0x240] sm:$0xff]  ;;  %v113_v21 = vrot.slane %v1604_v55, %v1625_v9 }
  0x53   :  { %613 = vmatprep.mubr.f32.mxu0 %v271_v22  ;;  %1208 = vmatpush3.msra.mxu1 %v318_v25  ;;  %v390_v2 = vld [vmem:[#allocation8 + $0x340] sm:$0xff]  ;;  %v373_v3 = vld [vmem:[#allocation8 + $0x2b8] sm:$0xff]  ;;  %v372_v7 = vld [vmem:[#allocation8 + $0x2b0] sm:$0xff]  ;;  %v109_v25 = vrot.slane %v1604_v55, %v1628_v12 }
  0x54   :  { %614 = vmatmul.mubr.f32.vlgmr.msra.gmra.mxu0 %v270_v24  ;;  %683 = vmatprep.mubr.f32.mxu1 %v273_v26  ;;  %v405_v4 = vld [vmem:[#allocation8 + $0x3b8] sm:$0xff]  ;;  %v404_v8 = vld [vmem:[#allocation8 + $0x3b0] sm:$0xff]  ;;  %v371_v13 = vld [vmem:[#allocation8 + $0x2a8] sm:$0xff] }
  0x55   :  { %1212 = vmatprep.subr.mxu0 %v381_v27  ;;  %1247 = vmatprep.subr.mxu1 %v413_v29  ;;  %v357_v5 = vld [vmem:[#allocation8 + $0x238] sm:$0xff]  ;;  %v356_v10 = vld [vmem:[#allocation8 + $0x230] sm:$0xff]  ;;  %v403_v14 = vld [vmem:[#allocation8 + $0x3a8] sm:$0xff] }
  0x56   :  { %684 = vmatmul.mubr.f32.vlgmr.msra.gmra.mxu1 %v272_v28  ;;  %1213 = vmatpush3.msra.mxu0 %v365_v30  ;;  %v389_v6 = vld [vmem:[#allocation8 + $0x338] sm:$0xff]  ;;  %v388_v11 = vld [vmem:[#allocation8 + $0x330] sm:$0xff]  ;;  %v355_v16 = vld [vmem:[#allocation8 + $0x228] sm:$0xff]  ;;  %v121_v28 = vrot.slane %v1604_v55, %v1631_v15 }
  0x57   :  { %1248 = vmatpush3.msra.mxu1 %v397_v31  ;;  %1214 = vmatprep.subr.mxu0 %v380_v32  ;;  %v387_v17 = vld [vmem:[#allocation8 + $0x328] sm:$0xff]  ;;  %v370_v19 = vld [vmem:[#allocation8 + $0x2a0] sm:$0xff]  ;;  %v369_v26 = vld [vmem:[#allocation8 + $0x298] sm:$0xff]  ;;  %v117_v32 = vrot.slane %v1604_v55, %v1634_v18 }
  0x58   :  { %1249 = vmatprep.subr.mxu1 %v412_v33  ;;  %1215 = vmatpush3.msra.mxu0 %v364_v34  ;;  %v402_v20 = vld [vmem:[#allocation8 + $0x3a0] sm:$0xff]  ;;  %v75_v24 = vld [vmem:[#allocation2 + $0x28] sm:$0xff]  ;;  %v401_v35 = vld [vmem:[#allocation8 + $0x398] sm:$0xff] }
  0x59   :  { %1250 = vmatpush3.msra.mxu1 %v396_v36  ;;  %1216 = vmatprep.subr.mxu0 %v379_v37  ;;  %v354_v22 = vld [vmem:[#allocation8 + $0x220] sm:$0xff]  ;;  %v353_v29 = vld [vmem:[#allocation8 + $0x218] sm:$0xff]  ;;  %v368_v33 = vld [vmem:[#allocation8 + $0x290] sm:$0xff]  ;;  %v175_v36 = vmul.f32 %v113_v21, %v75_v24  ;;  %v213_v37 = vrot.slane %v1606_v56, %v1625_v9 }
  0x5a   :  { %1251 = vmatprep.subr.mxu1 %v411_v38  ;;  %1217 = vmatpush3.msra.mxu0 %v363_v39  ;;  %v386_v23 = vld [vmem:[#allocation8 + $0x320] sm:$0xff]  ;;  %v385_v30 = vld [vmem:[#allocation8 + $0x318] sm:$0xff]  ;;  %v400_v34 = vld [vmem:[#allocation8 + $0x390] sm:$0xff] }
  0x5b   :  { %1252 = vmatpush3.msra.mxu1 %v395_v40  ;;  %1218 = vmatprep.subr.mxu0 %v378_v41  ;;  %v74_v27 = vld [vmem:[#allocation2 + $0x20] sm:$0xff]  ;;  %v77_v31 = vld [vmem:[#allocation2 + $0x38] sm:$0xff]  ;;  %v76_v38 = vld [vmem:[#allocation2 + $0x30] sm:$0xff] }
  0x5c   :  { %1253 = vmatprep.subr.mxu1 %v410_v42  ;;  %1219 = vmatpush3.msra.mxu0 %v362_v43  ;;  %v352_v39 = vld [vmem:[#allocation8 + $0x210] sm:$0xff]  ;;  %v174_v41 = vmul.f32 %v109_v25, %v74_v27  ;;  %v209_v42 = vrot.slane %v1606_v56, %v1628_v12  ;;  %v367_v55 = vld [vmem:[#allocation8 + $0x288] sm:$0xff]  ;;  %v425_v21 = vld [vmem:[#allocation8 + $0x458] sm:$0xff] }
  0x5d   :  { %1254 = vmatpush3.msra.mxu1 %v394_v46  ;;  %1220 = vmatprep.subr.mxu0 %v377_v47  ;;  %v384_v40 = vld [vmem:[#allocation8 + $0x310] sm:$0xff]  ;;  %v399_v43 = vld [vmem:[#allocation8 + $0x388] sm:$0xff]  ;;  %v177_v46 = vmul.f32 %v121_v28, %v77_v31  ;;  %v221_v47 = vrot.slane %v1606_v56, %v1631_v15  ;;  %v470_v31 = vld [vmem:[#allocation8 + $0x5c0] sm:$0xff] }
  0x5e   :  { %1255 = vmatprep.subr.mxu1 %v409_v48  ;;  %1221 = vmatpush3.msra.mxu0 %v361_v50  ;;  %v351_v48 = vld [vmem:[#allocation8 + $0x208] sm:$0xff]  ;;  %v472_v24 = vld [vmem:[#allocation8 + $0x5d0] sm:$0xff] }
  0x5f   :  { %1256 = vmatpush3.msra.mxu1 %v393_v51  ;;  %1222 = vmatprep.subr.mxu0 %v376_v52  ;;  %v383_v50 = vld [vmem:[#allocation8 + $0x308] sm:$0xff]  ;;  %v176_v51 = vmul.f32 %v117_v32, %v76_v38  ;;  %v217_v52 = vrot.slane %v1606_v56, %v1634_v18  ;;  %v477_v56 = vld [vmem:[#allocation8 + $0x5f8] sm:$0xff]  ;;  %v424_v25 = vld [vmem:[#allocation8 + $0x450] sm:$0xff] }
  0x60   :  { %1257 = vmatprep.subr.mxu1 %v408_v54  ;;  %1223 = vmatpush3.msra.mxu0 %v360_v57  ;;  %v366_v54 = vld [vmem:[#allocation8 + $0x280] sm:$0xff]  ;;  %v471_v27 = vld [vmem:[#allocation8 + $0x5c8] sm:$0xff]  ;;  %v453_v38 = vld [vmem:[#allocation8 + $0x538] sm:$0xff] }
  0x61   :  { %1258 = vmatpush3.msra.mxu1 %v392_v58  ;;  %1224 = vmatprep.subr.mxu0 %v375_v59  ;;  %v398_v57 = vld [vmem:[#allocation8 + $0x380] sm:$0xff]  ;;  %v275_v58 = vadd.f32 %v213_v37, %v175_v36  ;;  %v423_v28 = vld [vmem:[#allocation8 + $0x448] sm:$0xff]  ;;  %v469_v36 = vld [vmem:[#allocation8 + $0x5b8] sm:$0xff] }
  0x62   :  { %1259 = vmatprep.subr.mxu1 %v407_v60  ;;  %1225 = vmatpush3.msra.mxu0 %v359_v61  ;;  %v350_v59 = vld [vmem:[#allocation8 + $0x200] sm:$0xff]  ;;  %v274_v60 = vadd.f32 %v209_v42, %v174_v41  ;;  %v421_v37 = vld [vmem:[#allocation8 + $0x438] sm:$0xff]  ;;  %v420_v41 = vld [vmem:[#allocation8 + $0x430] sm:$0xff] }
  0x63   :  { %1260 = vmatpush3.msra.mxu1 %v391_v62  ;;  %1226 = vmatprep.subr.mxu0 %v374_v63  ;;  %v382_v61 = vld [vmem:[#allocation8 + $0x300] sm:$0xff]  ;;  %v277_v62 = vadd.f32 %v221_v47, %v177_v46  ;;  %v445_v63 = vld [vmem:[#allocation8 + $0x4f8] sm:$0xff]  ;;  %v452_v42 = vld [vmem:[#allocation8 + $0x530] sm:$0xff] }
  0x64   :  { %1261 = vmatprep.subr.mxu1 %v406_v0  ;;  %1227 = vmatpush3.msra.mxu0 %v358_v1  ;;  %v276_v0 = vadd.f32 %v217_v52, %v176_v51  ;;  %v429_v1 = vld [vmem:[#allocation8 + $0x478] sm:$0xff]  ;;  %v422_v32 = vld [vmem:[#allocation8 + $0x440] sm:$0xff]  ;;  %v467_v46 = vld [vmem:[#allocation8 + $0x5a8] sm:$0xff] }
  0x65   :  { %1262 = vmatpush3.msra.mxu1 %v390_v2  ;;  %1228 = vmatprep.subr.mxu0 %v373_v3  ;;  %v461_v2 = vld [vmem:[#allocation8 + $0x578] sm:$0xff]  ;;  %v444_v3 = vld [vmem:[#allocation8 + $0x4f0] sm:$0xff]  ;;  %v419_v47 = vld [vmem:[#allocation8 + $0x428] sm:$0xff] }
  0x66   :  { %1263 = vmatprep.subr.mxu1 %v405_v4  ;;  %1229 = vmatpush3.msra.mxu0 %v357_v5  ;;  %v476_v4 = vld [vmem:[#allocation8 + $0x5f0] sm:$0xff]  ;;  %v466_v51 = vld [vmem:[#allocation8 + $0x5a0] sm:$0xff] }
  0x67   :  { %1264 = vmatpush3.msra.mxu1 %v389_v6  ;;  %1230 = vmatprep.subr.mxu0 %v372_v7  ;;  %v428_v5 = vld [vmem:[#allocation8 + $0x470] sm:$0xff]  ;;  %v443_v7 = vld [vmem:[#allocation8 + $0x4e8] sm:$0xff]  ;;  %v418_v52 = vld [vmem:[#allocation8 + $0x420] sm:$0xff] }
  0x68   :  { %1265 = vmatprep.subr.mxu1 %v404_v8  ;;  %1231 = vmatpush3.msra.mxu0 %v356_v10  ;;  %v460_v6 = vld [vmem:[#allocation8 + $0x570] sm:$0xff]  ;;  %v475_v8 = vld [vmem:[#allocation8 + $0x5e8] sm:$0xff] }
  0x69   :  { %1266 = vmatpush3.msra.mxu1 %v388_v11  ;;  %1232 = vmatprep.subr.mxu0 %v371_v13  ;;  %v427_v10 = vld [vmem:[#allocation8 + $0x468] sm:$0xff]  ;;  %v442_v13 = vld [vmem:[#allocation8 + $0x4e0] sm:$0xff] }
  0x6a   :  { %1267 = vmatprep.subr.mxu1 %v403_v14  ;;  %1233 = vmatpush3.msra.mxu0 %v355_v16  ;;  %v459_v11 = vld [vmem:[#allocation8 + $0x568] sm:$0xff]  ;;  %v474_v14 = vld [vmem:[#allocation8 + $0x5e0] sm:$0xff] }
  0x6b   :  { %1268 = vmatpush3.msra.mxu1 %v387_v17  ;;  %1234 = vmatprep.subr.mxu0 %v370_v19  ;;  %v426_v16 = vld [vmem:[#allocation8 + $0x460] sm:$0xff]  ;;  %v441_v19 = vld [vmem:[#allocation8 + $0x4d8] sm:$0xff] }
  0x6c   :  { %1269 = vmatprep.subr.mxu1 %v402_v20  ;;  %1235 = vmatpush3.msra.mxu0 %v354_v22  ;;  %v458_v17 = vld [vmem:[#allocation8 + $0x560] sm:$0xff]  ;;  %v473_v20 = vld [vmem:[#allocation8 + $0x5d8] sm:$0xff] }
  0x6d   :  { %1270 = vmatpush3.msra.mxu1 %v386_v23  ;;  %1236 = vmatprep.subr.mxu0 %v369_v26  ;;  %v457_v22 = vld [vmem:[#allocation8 + $0x558] sm:$0xff]  ;;  %v440_v23 = vld [vmem:[#allocation8 + $0x4d0] sm:$0xff] }
  0x6e   :  { %1271 = vmatprep.subr.mxu1 %v401_v35  ;;  %1237 = vmatpush3.msra.mxu0 %v353_v29  ;;  %v456_v26 = vld [vmem:[#allocation8 + $0x550] sm:$0xff]  ;;  %v439_v35 = vld [vmem:[#allocation8 + $0x4c8] sm:$0xff] }
  0x6f   :  { %1272 = vmatpush3.msra.mxu1 %v385_v30  ;;  %1238 = vmatprep.subr.mxu0 %v368_v33  ;;  %v455_v29 = vld [vmem:[#allocation8 + $0x548] sm:$0xff]  ;;  %v438_v30 = vld [vmem:[#allocation8 + $0x4c0] sm:$0xff] }
  0x70   :  { %1273 = vmatprep.subr.mxu1 %v400_v34  ;;  %1239 = vmatpush3.msra.mxu0 %v352_v39  ;;  %v454_v33 = vld [vmem:[#allocation8 + $0x540] sm:$0xff]  ;;  %v437_v34 = vld [vmem:[#allocation8 + $0x4b8] sm:$0xff]  ;;  %v436_v39 = vld [vmem:[#allocation8 + $0x4b0] sm:$0xff] }
  0x71   :  { %1274 = vmatpush3.msra.mxu1 %v384_v40  ;;  %1240 = vmatprep.subr.mxu0 %v367_v55  ;;  %v468_v40 = vld [vmem:[#allocation8 + $0x5b0] sm:$0xff]  ;;  %v1652_v55 = vld [vmem:[#allocation5 + $0x8] sm:$0xff] }
  0x72   :  { %1275 = vmatprep.subr.mxu1 %v399_v43  ;;  %1241 = vmatpush3.msra.mxu0 %v351_v48  ;;  %v435_v43 = vld [vmem:[#allocation8 + $0x4a8] sm:$0xff] }
  0x73   :  { %1276 = vmatpush3.msra.mxu1 %v383_v50  ;;  %1242 = vmatprep.subr.mxu0 %v366_v54  ;;  %v451_v48 = vld [vmem:[#allocation8 + $0x528] sm:$0xff]  ;;  %v434_v50 = vld [vmem:[#allocation8 + $0x4a0] sm:$0xff]  ;;  %v129_v54 = vrot.slane %v1652_v55, %v1593_v44 }
  0x74   :  { %1277 = vmatprep.subr.mxu1 %v398_v57  ;;  %1243 = vmatpush3.msra.mxu0 %v350_v59  ;;  %v450_v57 = vld [vmem:[#allocation8 + $0x520] sm:$0xff]  ;;  %v1656_v59 = vld [vmem:[#allocation7 + $0x8] sm:$0xff] }
  0x75   :  { %753 = vmatprep.mubr.f32.mxu0 %v275_v58  ;;  %1278 = vmatpush3.msra.mxu1 %v382_v61  ;;  %v79_v58 = vld [vmem:[#allocation2 + $0x48] sm:$0xff]  ;;  %v433_v61 = vld [vmem:[#allocation8 + $0x498] sm:$0xff] }
  0x76   :  { %754 = vmatmul.mubr.f32.vlgmr.msra.gmra.mxu0 %v274_v60  ;;  %823 = vmatprep.mubr.f32.mxu1 %v277_v62  ;;  %v125_v60 = vrot.slane %v1652_v55, %v1596_v45  ;;  %v465_v62 = vld [vmem:[#allocation8 + $0x598] sm:$0xff] }
  0x77   :  { %1282 = vmatprep.subr.mxu0 %v445_v63  ;;  %1317 = vmatprep.subr.mxu1 %v477_v56  ;;  %v78_v63 = vld [vmem:[#allocation2 + $0x40] sm:$0xff]  ;;  %v417_v56 = vld [vmem:[#allocation8 + $0x418] sm:$0xff] }
  0x78   :  { %824 = vmatmul.mubr.f32.vlgmr.msra.gmra.mxu1 %v276_v0  ;;  %1283 = vmatpush3.msra.mxu0 %v429_v1  ;;  %v137_v0 = vrot.slane %v1652_v55, %v1599_v49  ;;  %v449_v1 = vld [vmem:[#allocation8 + $0x518] sm:$0xff] }
  0x79   :  { %1318 = vmatpush3.msra.mxu1 %v461_v2  ;;  %1284 = vmatprep.subr.mxu0 %v444_v3  ;;  %v81_v2 = vld [vmem:[#allocation2 + $0x58] sm:$0xff]  ;;  %v133_v3 = vrot.slane %v1652_v55, %v1602_v53 }
  0x7a   :  { %1319 = vmatprep.subr.mxu1 %v476_v4  ;;  %1285 = vmatpush3.msra.mxu0 %v428_v5  ;;  %v432_v4 = vld [vmem:[#allocation8 + $0x490] sm:$0xff] }
  0x7b   :  { %1320 = vmatpush3.msra.mxu1 %v460_v6  ;;  %1286 = vmatprep.subr.mxu0 %v443_v7  ;;  %v464_v5 = vld [vmem:[#allocation8 + $0x590] sm:$0xff]  ;;  %v179_v6 = vmul.f32 %v129_v54, %v79_v58  ;;  %v229_v7 = vrot.slane %v1656_v59, %v1593_v44  ;;  %v415_v44 = vld [vmem:[#allocation8 + $0x408] sm:$0xff] }
  0x7c   :  { %1321 = vmatprep.subr.mxu1 %v475_v8  ;;  %1287 = vmatpush3.msra.mxu0 %v427_v10  ;;  %v80_v8 = vld [vmem:[#allocation2 + $0x50] sm:$0xff] }
  0x7d   :  { %1322 = vmatpush3.msra.mxu1 %v459_v11  ;;  %1288 = vmatprep.subr.mxu0 %v442_v13  ;;  %v416_v10 = vld [vmem:[#allocation8 + $0x410] sm:$0xff]  ;;  %v178_v13 = vmul.f32 %v125_v60, %v78_v63  ;;  %v503_v60 = vld [vmem:[#allocation8 + $0x6c8] sm:$0xff] }
  0x7e   :  { %1323 = vmatprep.subr.mxu1 %v474_v14  ;;  %1289 = vmatpush3.msra.mxu0 %v426_v16  ;;  %v448_v11 = vld [vmem:[#allocation8 + $0x510] sm:$0xff]  ;;  %v225_v14 = vrot.slane %v1656_v59, %v1596_v45  ;;  %v431_v16 = vld [vmem:[#allocation8 + $0x488] sm:$0xff]  ;;  %v462_v45 = vld [vmem:[#allocation8 + $0x580] sm:$0xff] }
  0x7f   :  { %1324 = vmatpush3.msra.mxu1 %v458_v17  ;;  %1290 = vmatprep.subr.mxu0 %v441_v19  ;;  %v463_v17 = vld [vmem:[#allocation8 + $0x588] sm:$0xff]  ;;  %v181_v19 = vmul.f32 %v137_v0, %v81_v2  ;;  %v536_v54 = vld [vmem:[#allocation8 + $0x7d0] sm:$0xff]  ;;  %v502_v0 = vld [vmem:[#allocation8 + $0x6c0] sm:$0xff] }
  0x80   :  { %1325 = vmatprep.subr.mxu1 %v473_v20  ;;  %1291 = vmatpush3.msra.mxu0 %v425_v21  ;;  %v237_v20 = vrot.slane %v1656_v59, %v1599_v49  ;;  %v447_v21 = vld [vmem:[#allocation8 + $0x508] sm:$0xff]  ;;  %v446_v49 = vld [vmem:[#allocation8 + $0x500] sm:$0xff]  ;;  %v520_v58 = vld [vmem:[#allocation8 + $0x750] sm:$0xff] }
  0x81   :  { %1326 = vmatpush3.msra.mxu1 %v457_v22  ;;  %1292 = vmatprep.subr.mxu0 %v440_v23  ;;  %v180_v22 = vmul.f32 %v133_v3, %v80_v8  ;;  %v233_v23 = vrot.slane %v1656_v59, %v1602_v53  ;;  %v541_v53 = vld [vmem:[#allocation8 + $0x7f8] sm:$0xff]  ;;  %v519_v63 = vld [vmem:[#allocation8 + $0x748] sm:$0xff]  ;;  %v518_v2 = vld [vmem:[#allocation8 + $0x740] sm:$0xff] }
  0x82   :  { %1327 = vmatprep.subr.mxu1 %v472_v24  ;;  %1293 = vmatpush3.msra.mxu0 %v424_v25  ;;  %v430_v24 = vld [vmem:[#allocation8 + $0x480] sm:$0xff]  ;;  %v279_v25 = vadd.f32 %v229_v7, %v179_v6  ;;  %v501_v3 = vld [vmem:[#allocation8 + $0x6b8] sm:$0xff]  ;;  %v500_v7 = vld [vmem:[#allocation8 + $0x6b0] sm:$0xff] }
  0x83   :  { %1328 = vmatpush3.msra.mxu1 %v456_v26  ;;  %1294 = vmatprep.subr.mxu0 %v439_v35  ;;  %v414_v26 = vld [vmem:[#allocation8 + $0x400] sm:$0xff]  ;;  %v278_v35 = vadd.f32 %v225_v14, %v178_v13  ;;  %v517_v6 = vld [vmem:[#allocation8 + $0x738] sm:$0xff]  ;;  %v532_v8 = vld [vmem:[#allocation8 + $0x7b0] sm:$0xff] }
  0x84   :  { %1329 = vmatprep.subr.mxu1 %v471_v27  ;;  %1295 = vmatpush3.msra.mxu0 %v423_v28  ;;  %v281_v27 = vadd.f32 %v237_v20, %v181_v19  ;;  %v509_v28 = vld [vmem:[#allocation8 + $0x6f8] sm:$0xff]  ;;  %v499_v13 = vld [vmem:[#allocation8 + $0x6a8] sm:$0xff]  ;;  %v498_v19 = vld [vmem:[#allocation8 + $0x6a0] sm:$0xff] }
  0x85   :  { %1330 = vmatpush3.msra.mxu1 %v455_v29  ;;  %1296 = vmatprep.subr.mxu0 %v438_v30  ;;  %v280_v29 = vadd.f32 %v233_v23, %v180_v22  ;;  %v493_v30 = vld [vmem:[#allocation8 + $0x678] sm:$0xff]  ;;  %v531_v14 = vld [vmem:[#allocation8 + $0x7a8] sm:$0xff]  ;;  %v530_v20 = vld [vmem:[#allocation8 + $0x7a0] sm:$0xff] }
  0x86   :  { %1331 = vmatprep.subr.mxu1 %v470_v31  ;;  %1297 = vmatpush3.msra.mxu0 %v422_v32  ;;  %v525_v31 = vld [vmem:[#allocation8 + $0x778] sm:$0xff]  ;;  %v508_v32 = vld [vmem:[#allocation8 + $0x6f0] sm:$0xff]  ;;  %v514_v22 = vld [vmem:[#allocation8 + $0x720] sm:$0xff] }
  0x87   :  { %1332 = vmatpush3.msra.mxu1 %v454_v33  ;;  %1298 = vmatprep.subr.mxu0 %v437_v34  ;;  %v540_v33 = vld [vmem:[#allocation8 + $0x7f0] sm:$0xff]  ;;  %v497_v23 = vld [vmem:[#allocation8 + $0x698] sm:$0xff] }
  0x88   :  { %1333 = vmatprep.subr.mxu1 %v469_v36  ;;  %1299 = vmatpush3.msra.mxu0 %v421_v37  ;;  %v492_v34 = vld [vmem:[#allocation8 + $0x670] sm:$0xff]  ;;  %v507_v37 = vld [vmem:[#allocation8 + $0x6e8] sm:$0xff] }
  0x89   :  { %1334 = vmatpush3.msra.mxu1 %v453_v38  ;;  %1300 = vmatprep.subr.mxu0 %v436_v39  ;;  %v524_v36 = vld [vmem:[#allocation8 + $0x770] sm:$0xff]  ;;  %v539_v38 = vld [vmem:[#allocation8 + $0x7e8] sm:$0xff] }
  0x8a   :  { %1335 = vmatprep.subr.mxu1 %v468_v40  ;;  %1301 = vmatpush3.msra.mxu0 %v420_v41  ;;  %v491_v39 = vld [vmem:[#allocation8 + $0x668] sm:$0xff]  ;;  %v506_v41 = vld [vmem:[#allocation8 + $0x6e0] sm:$0xff] }
  0x8b   :  { %1336 = vmatpush3.msra.mxu1 %v452_v42  ;;  %1302 = vmatprep.subr.mxu0 %v435_v43  ;;  %v523_v40 = vld [vmem:[#allocation8 + $0x768] sm:$0xff]  ;;  %v538_v42 = vld [vmem:[#allocation8 + $0x7e0] sm:$0xff] }
  0x8c   :  { %1337 = vmatprep.subr.mxu1 %v467_v46  ;;  %1303 = vmatpush3.msra.mxu0 %v419_v47  ;;  %v490_v43 = vld [vmem:[#allocation8 + $0x660] sm:$0xff]  ;;  %v505_v47 = vld [vmem:[#allocation8 + $0x6d8] sm:$0xff] }
  0x8d   :  { %1338 = vmatpush3.msra.mxu1 %v451_v48  ;;  %1304 = vmatprep.subr.mxu0 %v434_v50  ;;  %v522_v46 = vld [vmem:[#allocation8 + $0x760] sm:$0xff]  ;;  %v537_v48 = vld [vmem:[#allocation8 + $0x7d8] sm:$0xff] }
  0x8e   :  { %1339 = vmatprep.subr.mxu1 %v466_v51  ;;  %1305 = vmatpush3.msra.mxu0 %v418_v52  ;;  %v489_v50 = vld [vmem:[#allocation8 + $0x658] sm:$0xff]  ;;  %v504_v52 = vld [vmem:[#allocation8 + $0x6d0] sm:$0xff] }
  0x8f   :  { %1340 = vmatpush3.msra.mxu1 %v450_v57  ;;  %1306 = vmatprep.subr.mxu0 %v433_v61  ;;  %v521_v51 = vld [vmem:[#allocation8 + $0x758] sm:$0xff]  ;;  %v488_v57 = vld [vmem:[#allocation8 + $0x650] sm:$0xff]  ;;  %v535_v61 = vld [vmem:[#allocation8 + $0x7c8] sm:$0xff] }
  0x90   :  { %1341 = vmatprep.subr.mxu1 %v465_v62  ;;  %1307 = vmatpush3.msra.mxu0 %v417_v56  ;;  %v487_v62 = vld [vmem:[#allocation8 + $0x648] sm:$0xff]  ;;  %v534_v56 = vld [vmem:[#allocation8 + $0x7c0] sm:$0xff] }
  0x91   :  { %1342 = vmatpush3.msra.mxu1 %v449_v1  ;;  %1308 = vmatprep.subr.mxu0 %v432_v4  ;;  %v486_v1 = vld [vmem:[#allocation8 + $0x640] sm:$0xff]  ;;  %v533_v4 = vld [vmem:[#allocation8 + $0x7b8] sm:$0xff] }
  0x92   :  { %1343 = vmatprep.subr.mxu1 %v464_v5  ;;  %1309 = vmatpush3.msra.mxu0 %v416_v10  ;;  %v485_v5 = vld [vmem:[#allocation8 + $0x638] sm:$0xff]  ;;  %v484_v10 = vld [vmem:[#allocation8 + $0x630] sm:$0xff] }
  0x93   :  { %1344 = vmatpush3.msra.mxu1 %v448_v11  ;;  %1310 = vmatprep.subr.mxu0 %v431_v16  ;;  %v516_v11 = vld [vmem:[#allocation8 + $0x730] sm:$0xff]  ;;  %v483_v16 = vld [vmem:[#allocation8 + $0x628] sm:$0xff] }
  0x94   :  { %1345 = vmatprep.subr.mxu1 %v463_v17  ;;  %1311 = vmatpush3.msra.mxu0 %v415_v44  ;;  %v515_v17 = vld [vmem:[#allocation8 + $0x728] sm:$0xff]  ;;  %v482_v44 = vld [vmem:[#allocation8 + $0x620] sm:$0xff] }
  0x95   :  { %1346 = vmatpush3.msra.mxu1 %v447_v21  ;;  %1312 = vmatprep.subr.mxu0 %v430_v24  ;;  %v145_v21 = vrot.slane %v1652_v55, %v1625_v9  ;;  %v83_v24 = vld [vmem:[#allocation2 + $0x68] sm:$0xff] }
  0x96   :  { %1347 = vmatprep.subr.mxu1 %v462_v45  ;;  %1313 = vmatpush3.msra.mxu0 %v414_v26  ;;  %v153_v45 = vrot.slane %v1652_v55, %v1631_v15  ;;  %v481_v26 = vld [vmem:[#allocation8 + $0x618] sm:$0xff] }
  0x97   :  { %893 = vmatprep.mubr.f32.mxu0 %v279_v25  ;;  %1348 = vmatpush3.msra.mxu1 %v446_v49  ;;  %v529_v25 = vld [vmem:[#allocation8 + $0x798] sm:$0xff]  ;;  %v141_v49 = vrot.slane %v1652_v55, %v1628_v12 }
  0x98   :  { %894 = vmatmul.mubr.f32.vlgmr.msra.gmra.mxu0 %v278_v35  ;;  %963 = vmatprep.mubr.f32.mxu1 %v281_v27  ;;  %v85_v35 = vld [vmem:[#allocation2 + $0x78] sm:$0xff]  ;;  %v149_v27 = vrot.slane %v1652_v55, %v1634_v18  ;;  %v253_v55 = vrot.slane %v1656_v59, %v1631_v15  ;;  %v526_v15 = vld [vmem:[#allocation8 + $0x780] sm:$0xff] }
  0x99   :  { %1352 = vmatprep.subr.mxu0 %v509_v28  ;;  %1387 = vmatprep.subr.mxu1 %v541_v53  ;;  %v513_v28 = vld [vmem:[#allocation8 + $0x718] sm:$0xff]  ;;  %v84_v53 = vld [vmem:[#allocation2 + $0x70] sm:$0xff] }
  0x9a   :  { %964 = vmatmul.mubr.f32.vlgmr.msra.gmra.mxu1 %v280_v29  ;;  %1353 = vmatpush3.msra.mxu0 %v493_v30  ;;  %v82_v29 = vld [vmem:[#allocation2 + $0x60] sm:$0xff]  ;;  %v496_v30 = vld [vmem:[#allocation8 + $0x690] sm:$0xff] }
  0x9b   :  { %1388 = vmatpush3.msra.mxu1 %v525_v31  ;;  %1354 = vmatprep.subr.mxu0 %v508_v32  ;;  %v528_v31 = vld [vmem:[#allocation8 + $0x790] sm:$0xff]  ;;  %v183_v32 = vmul.f32 %v145_v21, %v83_v24 }
  0x9c   :  { %1389 = vmatprep.subr.mxu1 %v540_v33  ;;  %1355 = vmatpush3.msra.mxu0 %v492_v34  ;;  %v245_v33 = vrot.slane %v1656_v59, %v1625_v9  ;;  %v480_v34 = vld [vmem:[#allocation8 + $0x610] sm:$0xff]  ;;  %v249_v9 = vrot.slane %v1656_v59, %v1634_v18 }
  0x9d   :  { %1390 = vmatpush3.msra.mxu1 %v524_v36  ;;  %1356 = vmatprep.subr.mxu0 %v507_v37  ;;  %v512_v36 = vld [vmem:[#allocation8 + $0x710] sm:$0xff]  ;;  %v185_v37 = vmul.f32 %v153_v45, %v85_v35 }
  0x9e   :  { %1391 = vmatprep.subr.mxu1 %v539_v38  ;;  %1357 = vmatpush3.msra.mxu0 %v491_v39  ;;  %v241_v38 = vrot.slane %v1656_v59, %v1628_v12  ;;  %v495_v39 = vld [vmem:[#allocation8 + $0x688] sm:$0xff]  ;;  %v478_v12 = vld [vmem:[#allocation8 + $0x600] sm:$0xff] }
  0x9f   :  { %1392 = vmatpush3.msra.mxu1 %v523_v40  ;;  %1358 = vmatprep.subr.mxu0 %v506_v41  ;;  %v527_v40 = vld [vmem:[#allocation8 + $0x788] sm:$0xff]  ;;  %v182_v41 = vmul.f32 %v141_v49, %v82_v29 }
  0xa0   :  { %1393 = vmatprep.subr.mxu1 %v538_v42  ;;  %1359 = vmatpush3.msra.mxu0 %v490_v43  ;;  %v184_v42 = vmul.f32 %v149_v27, %v84_v53  ;;  %v479_v43 = vld [vmem:[#allocation8 + $0x608] sm:$0xff] }
  0xa1   :  { %1394 = vmatpush3.msra.mxu1 %v522_v46  ;;  %1360 = vmatprep.subr.mxu0 %v505_v47  ;;  %v511_v46 = vld [vmem:[#allocation8 + $0x708] sm:$0xff]  ;;  %v494_v47 = vld [vmem:[#allocation8 + $0x680] sm:$0xff] }
  0xa2   :  { %1395 = vmatprep.subr.mxu1 %v537_v48  ;;  %1361 = vmatpush3.msra.mxu0 %v489_v50  ;;  %v283_v48 = vadd.f32 %v245_v33, %v183_v32  ;;  %v285_v50 = vadd.f32 %v253_v55, %v185_v37 }
  0xa3   :  { %1396 = vmatpush3.msra.mxu1 %v521_v51  ;;  %1362 = vmatprep.subr.mxu0 %v504_v52  ;;  %v510_v51 = vld [vmem:[#allocation8 + $0x700] sm:$0xff]  ;;  %v282_v52 = vadd.f32 %v241_v38, %v182_v41 }
  0xa4   :  { %1397 = vmatprep.subr.mxu1 %v536_v54  ;;  %1363 = vmatpush3.msra.mxu0 %v488_v57  ;;  %v284_v54 = vadd.f32 %v249_v9, %v184_v42 }
  0xa5   :  { %1398 = vmatpush3.msra.mxu1 %v520_v58  ;;  %1364 = vmatprep.subr.mxu0 %v503_v60 }
  0xa6   :  { %1399 = vmatprep.subr.mxu1 %v535_v61  ;;  %1365 = vmatpush3.msra.mxu0 %v487_v62  ;;  %v1141_v61 = vld [vmem:[%s1698_s4] ss:$0 sm:$0xff]  ;;  %s1547_s4 = smov [#allocation10]  }
  0xa7   :  { %1400 = vmatpush3.msra.mxu1 %v519_v63  ;;  %1366 = vmatprep.subr.mxu0 %v502_v0  ;;  %s1130_s13 = sshll.u32 %s1547_s4, 4  ;;  %s1131_s13 = int_to_ptr.vmem [resolvable:$true] %s1130_s13 }
  0xa8   :  { %1401 = vmatprep.subr.mxu1 %v534_v56  ;;  %1367 = vmatpush3.msra.mxu0 %v486_v1  ;;  %s1513_s14 = scalar_lea.vmem %s1131_s13, 128  ;;  %p1518_p7 = scmp.lt.s32.totalorder %s1131_s13, %s1131_s13 }
  0xa9   :  { %1402 = vmatpush3.msra.mxu1 %v518_v2  ;;  %1368 = vmatprep.subr.mxu0 %v501_v3  ;;  %p1514_p6 = scmp.ne.s32.totalorder %s1131_s13, %s1513_s14  ;;  %p1519_p8 = scmp.lt.s32.totalorder %s1513_s14, %s1513_s14 }
  0xaa   :  { %1403 = vmatprep.subr.mxu1 %v533_v4  ;;  %1369 = vmatpush3.msra.mxu0 %v485_v5 }
  0xab   :  { %1404 = vmatpush3.msra.mxu1 %v517_v6  ;;  %1370 = vmatprep.subr.mxu0 %v500_v7  ;;  %p1520_p9 = por %p1519_p8, %p1518_p7 }
  0xac   :  { %1405 = vmatprep.subr.mxu1 %v532_v8  ;;  %1371 = vmatpush3.msra.mxu0 %v484_v10 }
  0xad   :  { %1406 = vmatpush3.msra.mxu1 %v516_v11  ;;  %1372 = vmatprep.subr.mxu0 %v499_v13  ;;  %p1521_p10 = pnand %p1520_p9, %p1514_p6 }
  0xae   :  { %1407 = vmatprep.subr.mxu1 %v531_v14  ;;  %1373 = vmatpush3.msra.mxu0 %v483_v16 }
  0xaf   :  { %1408 = vmatpush3.msra.mxu1 %v515_v17  ;;  %1374 = vmatprep.subr.mxu0 %v498_v19 }
  0xb0   :  { %1409 = vmatprep.subr.mxu1 %v530_v20  ;;  %1375 = vmatpush3.msra.mxu0 %v482_v44 }
  0xb1   :  { %1410 = vmatpush3.msra.mxu1 %v514_v22  ;;  %1376 = vmatprep.subr.mxu0 %v497_v23 }
  0xb2   :  { %1411 = vmatprep.subr.mxu1 %v529_v25  ;;  %1377 = vmatpush3.msra.mxu0 %v481_v26 }
  0xb3   :  { %1412 = vmatpush3.msra.mxu1 %v513_v28  ;;  %1378 = vmatprep.subr.mxu0 %v496_v30 }
  0xb4   :  { %1413 = vmatprep.subr.mxu1 %v528_v31  ;;  %1379 = vmatpush3.msra.mxu0 %v480_v34 }
  0xb5   :  { %1414 = vmatpush3.msra.mxu1 %v512_v36  ;;  %1380 = vmatprep.subr.mxu0 %v495_v39 }
  0xb6   :  { %1415 = vmatprep.subr.mxu1 %v527_v40  ;;  %1381 = vmatpush3.msra.mxu0 %v479_v43 }
  0xb7   :  { %1416 = vmatpush3.msra.mxu1 %v511_v46  ;;  %1382 = vmatprep.subr.mxu0 %v494_v47 }
  0xb8   :  { %1417 = vmatprep.subr.mxu1 %v526_v15  ;;  %1383 = vmatpush3.msra.mxu0 %v478_v12 }
  0xb9   :  { %1033 = vmatprep.mubr.f32.mxu0 %v283_v48  ;;  %1418 = vmatpush3.msra.mxu1 %v510_v51 }
  0xba   :  { %1103 = vmatprep.mubr.f32.mxu1 %v285_v50  ;;  %1034 = vmatmul.mubr.f32.vlgmr.msra.gmra.mxu0 %v282_v52 }
  0xbb   :  { %1104 = vmatmul.mubr.f32.vlgmr.msra.gmra.mxu1 %v284_v54 }
 0x114   :  { %v1174_v18 = vpop.f32.mrf.mxu0 }
 0x116   :  { %v1209_v59 = vpop.f32.mrf.mxu1  ;;  %v1175_v57 = vpop.f32.mrf.mxu0 }
 0x117   :  { %v1176_v60 = vadd.f32 %v1175_v57, %v1174_v18 }
 0x118   :  { %v1210_v62 = vpop.f32.mrf.mxu1 }
 0x119   :  { %v616_v56 = vadd.f32 %v1176_v60, %v1141_v61  ;;  %v1211_v1 = vadd.f32 %v1210_v62, %v1209_v59 }
 0x11b   :  { %v686_v5 = vadd.f32 %v1211_v1, %v616_v56 }
 0x136   :  { %v1244_v58 = vpop.f32.mrf.mxu0 }
 0x138   :  { %v1279_v63 = vpop.f32.mrf.mxu1  ;;  %v1245_v0 = vpop.f32.mrf.mxu0 }
 0x139   :  { %v1246_v3 = vadd.f32 %v1245_v0, %v1244_v58 }
 0x13a   :  { %v1280_v4 = vpop.f32.mrf.mxu1 }
 0x13b   :  { %v756_v8 = vadd.f32 %v1246_v3, %v686_v5  ;;  %v1281_v10 = vadd.f32 %v1280_v4, %v1279_v63 }
 0x13d   :  { %v826_v14 = vadd.f32 %v1281_v10, %v756_v8 }
 0x158   :  { %v1314_v2 = vpop.f32.mrf.mxu0 }
 0x15a   :  { %v1349_v6 = vpop.f32.mrf.mxu1  ;;  %v1315_v7 = vpop.f32.mrf.mxu0 }
 0x15b   :  { %v1316_v11 = vadd.f32 %v1315_v7, %v1314_v2 }
 0x15c   :  { %v1350_v13 = vpop.f32.mrf.mxu1 }
 0x15d   :  { %v896_v16 = vadd.f32 %v1316_v11, %v826_v14  ;;  %v1351_v17 = vadd.f32 %v1350_v13, %v1349_v6 }
 0x15f   :  { %v966_v22 = vadd.f32 %v1351_v17, %v896_v16 }
 0x17a   :  { %v1384_v19 = vpop.f32.mrf.mxu0 }
 0x17b   :  { %v1419_v20 = vpop.f32.mrf.mxu1 }
 0x17c   :  { %v1385_v44 = vpop.f32.mrf.mxu0 }
 0x17d   :  { %v1420_v21 = vpop.f32.mrf.mxu1  ;;  %v1386_v23 = vadd.f32 %v1385_v44, %v1384_v19 }
 0x17e   :  { %v1421_v45 = vadd.f32 %v1420_v21, %v1419_v20 }
 0x17f   :  { %v1036_v24 = vadd.f32 %v1386_v23, %v966_v22 }
 0x181   :  { %v1106_v25 = vadd.f32 %v1421_v45, %v1036_v24 }
 0x183   :  { %v1109_v26 = vmul.f32 %v1106_v25, %v1106_v25 }
 0x185   :  { %1110 = vadd.xlane.f32.xlu0 %v1109_v26 }
 0x20e   :  { %v1111_v35 = vpop.xlane.xlu0 %1110 }
 0x20f   :  { %1429 = vrsqrt.f32 %v1111_v35  ;;  %vm1114_vm0 = vcmp.eq.f32.partialorder %v1111_v35, inf  ;;  %v1117_v28 = vand.u32 2147483648, %v1111_v35  ;;  %vm1116_vm1 = vcmp.eq.f32.partialorder %v1111_v35, 0.0 }
 0x21c   :  { %v1430_v49 = vpop.eup %1429 }
 0x21d   :  { %v1113_v27 = vmul.f32 %v1430_v49, %v1111_v35 }
 0x21f   :  { %v1115_v29 = vsel %vm1114_vm0, %v1111_v35, %v1113_v27 }
 0x220   :  { %v1118_v53 = vsel %vm1116_vm1, %v1117_v28, %v1115_v29 }
 0x221   :  { %v1119_v30 = vmax.f32 %v1118_v53, 1e-12 }
 0x223   :  { %1431 = vrcp.f32 %v1119_v30 }
 0x230   :  { %v1432_v31 = vpop.eup %1431 }
 0x231   :  { %v1122_v32 = vmul.f32 %v1432_v31, %v1106_v25 }
 0x233   :  { %1123 = vst [vmem:[#allocation10] sm:$0xff] %v1122_v32 }
 0x234   :  { %1524 = shalt.err (!%p1521_p10)
}
 0x235   :  { %1133 = dma.vmem_to_hbm [thread:$0]  %s1131_s13, 128, %s1699_s5, [#allocation4]  }
 0x236   :  { %1539 = dma.done.wait [#allocation4], 128  }
 0x237   :  { %1540 = vsyncadd [#allocation4], 4294967168 }
 0x238   :  { %1137 = vsyncpa [#allocation3], 1 }
 0x239   :  { %1138 = vsyncpa [#allocation6], 1 }
 0x23a   :  { %1139 = vsyncpa [#allocation9], 1 }
 0x23b   :  { %1140 = vsyncpa [#allocation4], 1 }

</bundles_post_ra>
